<compile_context>
chip_gen: v7x
topology: tpu7x:2x2x1
jax: 0.10.0
libtpu: 0.0.40
codegen_flags: <defaults>
</compile_context>

<pallas_src>
import math
import functools

import jax
import jax.numpy as jnp
from jax import lax
from jax.experimental import pallas as pl
from jax.experimental.pallas import tpu as pltpu

_HALF_PI = math.pi / 2.0
_LOG_10000 = math.log(10000.0)


# ----------------------------------------------------------------------------
# Pallas kernel: one (bt, tx, Y*ch) lane-dense block of the positional encoding
# ----------------------------------------------------------------------------
def _pe2d_kernel(idx_ref, o_ref, *, C, c4):
    """idx_ref: (2, Y*ch) int32 -> row0 = y index, row1 = channel index of each lane.

    Channel layout (matches the PyTorch module, C = ceil(ch/2), c4 = C//2):
      c in [0,   c4) : sin(x * f_c)
      c in [c4,  C ) : cos(x * f_{c-c4})
      c in [C, C+c4) : sin(y * f_{c-C})
      c in [C+c4, ch): cos(y * f_{c-C-c4})
    with f_k = 10000 ** (-(2k)/C).
    """
    bt, tx, Yc = o_ref.shape

    j = idx_ref[0:1, :]                                   # (1, Yc) y (column) index
    c = idx_ref[1:2, :]                                   # (1, Yc) channel index

    use_x = c < C                                         # first half -> x position
    cc = jnp.where(use_x, c, c - C)                       # channel within its half
    is_cos = cc >= c4
    k = jnp.where(is_cos, cc - c4, cc).astype(jnp.float32)

    # inv_freq[k] = 10000 ** (-(2k)/C)   (the module's registered buffer)
    freq = jnp.exp(k * jnp.float32(-2.0 * _LOG_10000 / C))        # (1, Yc)
    phase = jnp.where(is_cos, jnp.float32(_HALF_PI), jnp.float32(0.0))
    pos_y = j.astype(jnp.float32)                                 # (1, Yc)

    # x (row) positions for this row tile.
    row0 = pl.program_id(1) * tx
    pos_x = (lax.broadcasted_iota(jnp.int32, (tx, 1), 0) + row0).astype(jnp.float32)

    pos = jnp.where(use_x, pos_x, pos_y)                          # (tx, Yc)
    # cos(t) == sin(t + pi/2): one EUP transcendental per output element.
    pe = jnp.sin(pos * freq + phase)                              # (tx, Yc) f32

    # Identical encoding for every batch element in this block (the .repeat()).
    o_ref[...] = jnp.broadcast_to(pe, (bt, tx, Yc)).astype(o_ref.dtype)


# ----------------------------------------------------------------------------
# Wrapper (equivalent of PositionalEncoding2D.forward)
# ----------------------------------------------------------------------------
def _largest_divisor(n, limit, multiple_of=1):
    best = 0
    for d in range(1, n + 1):
        if n % d == 0 and d <= limit and d % multiple_of == 0:
            best = d
    return best


def positional_encoding_2d(x):
    """x: (batch, x, y, ch) channels-last. Returns the PE volume, same shape/dtype."""
    if x.ndim != 4:
        raise RuntimeError("The input tensor has to be 4d!")
    b, X, Y, ch = x.shape
    C = int(math.ceil(ch / 2))
    if C % 2 != 0:
        # Same implicit constraint as the PyTorch module (the emb_x assignment
        # requires 2*ceil(C/2) == C, i.e. C even).
        raise ValueError(f"ceil(ch/2)={C} must be even (ch={ch}).")
    c4 = C // 2
    Yc = Y * ch

    # --- tile selection: keep each (double-buffered) output block small -----
    itemsize = jnp.dtype(x.dtype).itemsize
    row_bytes = Yc * itemsize
    budget = 4 << 20                                    # ~4 MiB per block
    max_rows = max(1, budget // row_bytes)
    if X <= max_rows:
        tx = X                                          # full dim: always legal
    else:
        tx = _largest_divisor(X, max_rows, multiple_of=8) or X
    bt = _largest_divisor(b, max(1, budget // (tx * row_bytes))) or 1

    # --- tiny grid-invariant index table: lane q -> (y index, channel index) -
    q = jnp.arange(Yc, dtype=jnp.int32)
    idx_tbl = jnp.stack([q // ch, q % ch], axis=0)      # (2, Y*ch) int32

    out2d = pl.pallas_call(
        functools.partial(_pe2d_kernel, C=C, c4=c4),
        out_shape=jax.ShapeDtypeStruct((b, X, Yc), x.dtype),
        grid_spec=pltpu.PrefetchScalarGridSpec(
            num_scalar_prefetch=0,
            grid=(b // bt, X // tx),
            in_specs=[pl.BlockSpec((2, Yc), lambda ib, ix: (0, 0))],
            out_specs=pl.BlockSpec((bt, tx, Yc), lambda ib, ix: (ib, ix, 0)),
        ),
        compiler_params=pltpu.CompilerParams(
            dimension_semantics=("parallel", "parallel")),
    )(idx_tbl)

    # Layout plumbing only: (b, X, Y*ch) -> (b, X, Y, ch).
    return out2d.reshape(b, X, Y, ch)


# ----------------------------------------------------------------------------
# Pure-JAX reference (mirrors the PyTorch forward) for verification
# ----------------------------------------------------------------------------
def positional_encoding_2d_reference(x):
    b, X, Y, ch = x.shape
    C = int(math.ceil(ch / 2))
    inv_freq = 1.0 / (10000.0 ** (jnp.arange(0, C, 2, dtype=jnp.float32) / C))
    sx = jnp.arange(X, dtype=jnp.float32)[:, None] * inv_freq[None, :]
    sy = jnp.arange(Y, dtype=jnp.float32)[:, None] * inv_freq[None, :]
    emb_x = jnp.concatenate([jnp.sin(sx), jnp.cos(sx)], axis=-1)   # (X, C)
    emb_y = jnp.concatenate([jnp.sin(sy), jnp.cos(sy)], axis=-1)   # (Y, C)
    emb = jnp.zeros((X, Y, 2 * C), jnp.float32)
    emb = emb.at[:, :, :C].set(emb_x[:, None, :])
    emb = emb.at[:, :, C:2 * C].set(emb_y[None, :, :])
    pe = emb[:, :, :ch]
    return jnp.broadcast_to(pe[None], (b, X, Y, ch)).astype(x.dtype)


# ----------------------------------------------------------------------------
if __name__ == "__main__":
    key = jax.random.PRNGKey(0)
    b, X, Y, ch = 2, 16, 16, 32
    x = jax.random.normal(key, (b, X, Y, ch), dtype=jnp.float32)

    out = jax.block_until_ready(positional_encoding_2d(x))
    ref = jax.block_until_ready(positional_encoding_2d_reference(x))

    assert out.shape == (b, X, Y, ch) and out.dtype == x.dtype
    err = float(jnp.max(jnp.abs(out - ref)))
    assert err < 1e-3, err
    print("KERNEL_OK")
</pallas_src>

<mosaic_0001>
module attributes {stable_mosaic.version = 11 : i64} {
  func.func @_pe2d_kernel(%arg0: i32, %arg1: i32, %arg2: memref<2x512xi32, #tpu.memory_space<vmem>>, %arg3: memref<2x16x512xf32, #tpu.memory_space<vmem>>) attributes {dimension_semantics = [#tpu.dimension_semantics<parallel>, #tpu.dimension_semantics<parallel>], iteration_bounds = array<i64: 1, 1>, scalar_prefetch = 0 : i64, scratch_operands = 0 : i64, tpu.core_type = #tpu.core_type<tc>, window_params = [{pipeline_mode = #tpu.pipeline_mode<synchronous>, transform_indices = @transform_0, window_bounds = array<i64: 2, 512>}, {transform_indices = @transform_1, window_bounds = array<i64: 2, 16, 512>}]} {
    %c0 = arith.constant 0 : index
    %c0_0 = arith.constant 0 : index
    %0 = vector.load %arg2[%c0, %c0_0] : memref<2x512xi32, #tpu.memory_space<vmem>>, vector<1x512xi32>
    %c1 = arith.constant 1 : index
    %c0_1 = arith.constant 0 : index
    %1 = vector.load %arg2[%c1, %c0_1] : memref<2x512xi32, #tpu.memory_space<vmem>>, vector<1x512xi32>
    %c16_i32 = arith.constant 16 : i32
    %2 = vector.broadcast %c16_i32 : i32 to vector<1x512xi32>
    %3 = arith.cmpi slt, %1, %2 : vector<1x512xi32>
    %c16_i32_2 = arith.constant 16 : i32
    %4 = vector.broadcast %c16_i32_2 : i32 to vector<1x512xi32>
    %5 = arith.subi %1, %4 : vector<1x512xi32>
    %6 = arith.select %3, %1, %5 : vector<1x512xi1>, vector<1x512xi32>
    %c8_i32 = arith.constant 8 : i32
    %7 = vector.broadcast %c8_i32 : i32 to vector<1x512xi32>
    %8 = arith.cmpi sge, %6, %7 : vector<1x512xi32>
    %c8_i32_3 = arith.constant 8 : i32
    %9 = vector.broadcast %c8_i32_3 : i32 to vector<1x512xi32>
    %10 = arith.subi %6, %9 : vector<1x512xi32>
    %11 = arith.select %8, %10, %6 : vector<1x512xi1>, vector<1x512xi32>
    %12 = arith.sitofp %11 : vector<1x512xi32> to vector<1x512xf32>
    %cst = arith.constant -1.15129256 : f32
    %13 = vector.broadcast %cst : f32 to vector<1x512xf32>
    %14 = arith.mulf %12, %13 : vector<1x512xf32>
    %15 = math.exp %14 : vector<1x512xf32>
    %cst_4 = arith.constant 1.57079637 : f32
    %cst_5 = arith.constant 0.000000e+00 : f32
    %16 = vector.broadcast %cst_4 : f32 to vector<1x512xf32>
    %17 = vector.broadcast %cst_5 : f32 to vector<1x512xf32>
    %18 = arith.select %8, %16, %17 : vector<1x512xi1>, vector<1x512xf32>
    %19 = arith.sitofp %0 : vector<1x512xi32> to vector<1x512xf32>
    %c16_i32_6 = arith.constant 16 : i32
    %20 = arith.muli %arg1, %c16_i32_6 : i32
    %21 = tpu.iota {dimensions = array<i32: 0>} : vector<16x1xi32>
    %22 = vector.broadcast %20 : i32 to vector<16x1xi32>
    %23 = arith.addi %21, %22 : vector<16x1xi32>
    %24 = arith.sitofp %23 : vector<16x1xi32> to vector<16x1xf32>
    %25 = vector.shape_cast %3 : vector<1x512xi1> to vector<1x512xi1>
    %26 = vector.broadcast %25 : vector<1x512xi1> to vector<16x512xi1>
    %27 = vector.shape_cast %24 : vector<16x1xf32> to vector<16x1xf32>
    %28 = vector.broadcast %27 : vector<16x1xf32> to vector<16x512xf32>
    %29 = vector.shape_cast %19 : vector<1x512xf32> to vector<1x512xf32>
    %30 = vector.broadcast %29 : vector<1x512xf32> to vector<16x512xf32>
    %31 = arith.select %26, %28, %30 : vector<16x512xi1>, vector<16x512xf32>
    %32 = vector.broadcast %15 : vector<1x512xf32> to vector<16x512xf32>
    %33 = arith.mulf %31, %32 : vector<16x512xf32>
    %34 = vector.broadcast %18 : vector<1x512xf32> to vector<16x512xf32>
    %35 = arith.addf %33, %34 : vector<16x512xf32>
    %36 = math.sin %35 : vector<16x512xf32>
    %37 = vector.shape_cast %36 : vector<16x512xf32> to vector<1x16x512xf32>
    %38 = vector.broadcast %37 : vector<1x16x512xf32> to vector<2x16x512xf32>
    %c0_7 = arith.constant 0 : index
    %c0_8 = arith.constant 0 : index
    %c0_9 = arith.constant 0 : index
    %39 = vector.load %arg3[%c0_7, %c0_8, %c0_9] : memref<2x16x512xf32, #tpu.memory_space<vmem>>, vector<2x16x512xf32>
    tpu.vector_store %arg3[%c0_7, %c0_8, %c0_9], %38 {strides = array<i32>} : memref<2x16x512xf32, #tpu.memory_space<vmem>>, vector<2x16x512xf32>,
    return
  }
  func.func @transform_0(%arg0: i32, %arg1: i32) -> (i32, i32) {
    %c0_i32 = arith.constant 0 : i32
    %c0_i32_0 = arith.constant 0 : i32
    %c0_i32_1 = arith.constant 0 : i32
    return %c0_i32, %c0_i32_0 : i32, i32
  }
  func.func @transform_1(%arg0: i32, %arg1: i32) -> (i32, i32, i32) {
    %c0_i32 = arith.constant 0 : i32
    %c0_i32_0 = arith.constant 0 : i32
    return %arg0, %arg1, %c0_i32 : i32, i32, i32
  }
}

</mosaic_0001>

<bundles_post_ra>
// kernel: tpu_custom_call.1
= control target key start
LH: loop header
LB: loop body
LE: loop exit
PB: predicated region body
PF: predicated region fallthrough
CT: control target
= control target key end

     0   :  { %6 = vsyncpa [#allocation3], 0  ;;  %s1889_s0 = inlined_call_operand.hbm [shape: s32[2,512], index: 0, kind: input, shape index: {}]   ;;  %s1890_s1 = inlined_call_operand.hbm [shape: f32[2,16,512], index: 1, kind: output, shape index: {}]  }
   0x1   :  { %7 = vsyncpa [#allocation4], 0  ;;  %s1178_s6 = smov [#allocation2]   ;;  %s1130_s10 = scalar_lea.hbm %s1889_s0, 128 }
   0x2   :  { %s14_s7 = sshll.u32 %s1178_s6, 4  ;;  %p1131_p0 = scmp.ne.s32.totalorder %s1889_s0, %s1130_s10  ;;  %s15_s7 = int_to_ptr.vmem [resolvable:$true] %s14_s7 }
   0x3   :  { %p1134_p1 = scmp.lt.u32.totalorder %s1130_s10, %s1889_s0 }
   0x5   :  { %p1136_p2 = pnand %p1134_p1, %p1131_p0 }
   0x7   :  { %1139 = shalt.err (!%p1136_p2)
}
   0x8   :  { %s1140_s15 = scalar_lea.vmem %s15_s7, 128  ;;  %p1145_p4 = scmp.lt.s32.totalorder %s15_s7, %s15_s7 }
   0x9   :  { %p1141_p3 = scmp.ne.s32.totalorder %s15_s7, %s1140_s15  ;;  %p1146_p5 = scmp.lt.s32.totalorder %s1140_s15, %s1140_s15 }
   0xb   :  { %p1147_p6 = por %p1146_p5, %p1145_p4 }
   0xd   :  { %p1148_p7 = pnand %p1147_p6, %p1141_p3 }
   0xf   :  { %1151 = shalt.err (!%p1148_p7)
}
  0x10   :  { %17 = dma.hbm_to_vmem [thread:$0]  %s1889_s0, 128, %s15_s7, [#allocation3]  }
  0x11   :  { %1174 = dma.done.wait [#allocation3], 128  }
  0x12   :  { %1175 = vsyncadd [#allocation3], 4294967168  ;;  %v37_v0 = vlaneseq  ;;  %v21_v5 = vld [vmem:[#allocation2] ss:$2 sm:$0xf]  ;;  %v1179_v10 = vmov 0  }
  0x13   :  { %v23_v6 = vld [vmem:[#allocation2 + $0x1] ss:$2 sm:$0xf]  ;;  %v35_v8 = vcvt.s32.f32 %v21_v5  ;;  %v1180_v32 = vmov 0.0   ;;  %s1187_s0 = smov [#allocation5]  }
  0x14   :  { %v38_v1 = vshrl.u32 %v37_v0, 7  ;;  %vm24_vm0 = vcmp.lt.s32.totalorder %v23_v6, 16  ;;  %v1018_v7 = vadd.s32 4294967280, %v23_v6  ;;  %s1006_s18 = sshll.u32 %s1187_s0, 4  ;;  %s1007_s18 = int_to_ptr.vmem [resolvable:$true] %s1006_s18 }
  0x15   :  { %v45_v11 = vsel %vm24_vm0, 1, %v1179_v10  ;;  %s1152_s19 = scalar_lea.vmem %s1007_s18, 2048  ;;  %p1157_p9 = scmp.lt.s32.totalorder %s1007_s18, %s1007_s18 }
  0x16   :  { %v48_v2 = vsub.s32 0, %v38_v1  ;;  %v52_v3 = vsub.s32 1, %v38_v1  ;;  %v56_v4 = vsub.s32 2, %v38_v1  ;;  %v39_v9 = vadd.s32 8, %v38_v1  ;;  %p1153_p8 = scmp.ne.s32.totalorder %s1007_s18, %s1152_s19  ;;  %p1158_p10 = scmp.lt.s32.totalorder %s1152_s19, %s1152_s19 }
  0x17   :  { %v26_v12 = vsel %vm24_vm0, %v23_v6, %v1018_v7  ;;  %v43_v31 = vcvt.s32.f32 %v38_v1  ;;  %v60_v34 = vsub.s32 3, %v38_v1 }
  0x18   :  { %v49_v13 = vrot.slane %v45_v11, %v48_v2  ;;  %v53_v14 = vrot.slane %v45_v11, %v52_v3  ;;  %vm27_vm1 = vcmp.ge.s32.totalorder %v26_v12, 8  ;;  %v1019_v15 = vadd.s32 4294967288, %v26_v12  ;;  %p1159_p11 = por %p1158_p10, %p1157_p9 }
  0x19   :  { %v57_v16 = vrot.slane %v45_v11, %v56_v4  ;;  %v70_v17 = vrot.slane %v35_v8, %v48_v2  ;;  %v74_v18 = vrot.slane %v35_v8, %v52_v3  ;;  %v78_v19 = vrot.slane %v35_v8, %v56_v4 }
  0x1a   :  { %v1212_v20 = vcvt.s32.f32 %v39_v9  ;;  %v29_v21 = vsel %vm27_vm1, %v1019_v15, %v26_v12  ;;  %vm1215_vm2 = vcmp.eq.s32.totalorder %v49_v13, 1  ;;  %vm1219_vm3 = vcmp.eq.s32.totalorder %v53_v14, 1  ;;  %p1160_p12 = pnand %p1159_p11, %p1153_p8 }
  0x1b   :  { %v30_v24 = vcvt.s32.f32 %v29_v21  ;;  %vm1223_vm4 = vcmp.eq.s32.totalorder %v57_v16, 1  ;;  %v34_v33 = vsel %vm27_vm1, 1.5707964, %v1180_v32  ;;  %v87_v35 = vsel %vm1215_vm2, %v43_v31, %v70_v17 }
  0x1c   :  { %v91_v27 = vsel %vm1215_vm2, %v1212_v20, %v70_v17  ;;  %v92_v28 = vsel %vm1219_vm3, %v1212_v20, %v74_v18  ;;  %v93_v29 = vsel %vm1223_vm4, %v1212_v20, %v78_v19  ;;  %v128_v37 = vrot.slane %v34_v33, %v48_v2 }
  0x1d   :  { %v31_v26 = vmul.f32 -1.1512926, %v30_v24  ;;  %v88_v38 = vsel %vm1219_vm3, %v43_v31, %v74_v18  ;;  %v132_v39 = vrot.slane %v34_v33, %v52_v3  ;;  %v89_v40 = vsel %vm1223_vm4, %v43_v31, %v78_v19 }
  0x1e   :  { %v61_v44 = vrot.slane %v45_v11, %v60_v34  ;;  %v136_v45 = vrot.slane %v34_v33, %v56_v4  ;;  %v1251_v55 = vrot.slane %v35_v8, %v60_v34  ;;  %v1276_v11 = vrot.slane %v34_v33, %v60_v34 }
  0x1f   :  { %v32_v30 = vmul.f32 1.442695, %v31_v26  ;;  %v1182_v32 = vmov 2475754826  }
  0x20   :  { %vm1247_vm5 = vcmp.eq.s32.totalorder %v61_v44, 1 }
  0x21   :  { %1096 = vpow2.f32 %v32_v30  ;;  %v1181_v30 = vmov 683565275  }
  0x2b   :  { %v1097_v36 = vpop.eup %1096 }
  0x2c   :  { %v99_v41 = vrot.slane %v1097_v36, %v48_v2  ;;  %v103_v42 = vrot.slane %v1097_v36, %v52_v3  ;;  %v107_v43 = vrot.slane %v1097_v36, %v56_v4  ;;  %v1265_v0 = vrot.slane %v1097_v36, %v60_v34 }
  0x2d   :  { %v90_v3 = vsel %vm1247_vm5, %v43_v31, %v1251_v55  ;;  %v1183_v34 = vmov 2131351028   ;;  %v1184_v36 = vmov 2102212464  }
  0x2e   :  { %v116_v46 = vmul.f32 %v99_v41, %v87_v35  ;;  %v117_v47 = vmul.f32 %v103_v42, %v88_v38  ;;  %v118_v48 = vmul.f32 %v107_v43, %v89_v40  ;;  %v120_v49 = vmul.f32 %v99_v41, %v91_v27 }
  0x2f   :  { %v121_v50 = vmul.f32 %v103_v42, %v92_v28  ;;  %v122_v51 = vmul.f32 %v107_v43, %v93_v29  ;;  %v119_v10 = vmul.f32 %v1265_v0, %v90_v3  ;;  %v1185_v38 = vmov 920167782  }
  0x30   :  { %v1243_v52 = vadd.f32 %v128_v37, %v116_v46  ;;  %v1245_v53 = vadd.f32 %v132_v39, %v117_v47  ;;  %v1253_v56 = vadd.f32 %v136_v45, %v118_v48  ;;  %v1255_v57 = vadd.f32 %v128_v37, %v120_v49 }
  0x31   :  { %v1257_v58 = vadd.f32 %v132_v39, %v121_v50  ;;  %v1259_v59 = vadd.f32 %v136_v45, %v122_v51  ;;  %v1280_v19 = vadd.f32 %v1276_v11, %v119_v10  ;;  %v1186_v46 = vmov 1326507024  }
  0x32   :  { %v153_v60 = vand.u32 2147483647, %v1243_v52  ;;  %v156_v61 = vand.u32 2139095040, %v1243_v52  ;;  %v257_v62 = vand.u32 2147483647, %v1245_v53  ;;  %v260_v63 = vand.u32 2139095040, %v1245_v53 }
  0x33   :  { %v364_v6 = vand.u32 2139095040, %v1253_v56  ;;  %v361_v16 = vand.u32 2147483647, %v1253_v56  ;;  %vm155_vm2 = vcmp.lt.s32.totalorder %v1243_v52, 0 }
  0x34   :  { %v157_v1 = vshrl.u32 %v156_v61, 23  ;;  %v160_v2 = vand.u32 8388607, %v153_v60  ;;  %v261_v4 = vshrl.u32 %v260_v63, 23  ;;  %v264_v5 = vand.u32 8388607, %v257_v62 }
  0x35   :  { %v365_v9 = vshrl.u32 %v364_v6, 23  ;;  %v1288_v27 = vand.u32 8388607, %v361_v16  ;;  %vm1375_vm4 = vcmp.le.f32.partialorder %v153_v60, 0.7853982 }
  0x36   :  { %v1020_v7 = vadd.s32 4294967169, %v157_v1  ;;  %v1024_v8 = vadd.s32 4294967169, %v261_v4  ;;  %v161_v12 = vor.u32 8388608, %v160_v2  ;;  %v265_v14 = vor.u32 8388608, %v264_v5 }
  0x37   :  { %v1028_v17 = vadd.s32 4294967169, %v365_v9 }
  0x38   :  { %v163_v13 = vadd.s32 1, %v1020_v7  ;;  %v267_v15 = vadd.s32 1, %v1024_v8  ;;  %v1282_v23 = vshll.u32 %v161_v12, 8  ;;  %v1284_v26 = vshll.u32 %v265_v14, 8 }
  0x39   :  { %v1290_v28 = vadd.s32 1, %v1028_v17 }
  0x3a   :  { %vm164_vm6 = vcmp.gt.s32.totalorder %v163_v13, 0  ;;  %vm268_vm7 = vcmp.gt.s32.totalorder %v267_v15, 0 }
  0x3b   :  { %v165_v18 = vsel %vm164_vm6, %v163_v13, 0  ;;  %v269_v24 = vsel %vm268_vm7, %v267_v15, 0  ;;  %vm372_vm12 = vcmp.gt.s32.totalorder %v1290_v28, 0 }
  0x3c   :  { %v166_v21 = vshrl.u32 %v165_v18, 5  ;;  %v167_v22 = vand.u32 31, %v165_v18  ;;  %v271_v25 = vand.u32 31, %v269_v24  ;;  %v1297_v40 = vshrl.u32 %v269_v24, 5 }
  0x3e   :  { %v168_v29 = vsub.s32 32, %v167_v22  ;;  %v170_v31 = vshll.u32 %v1181_v30, %v167_v22  ;;  %v173_v33 = vshll.u32 %v1182_v32, %v167_v22  ;;  %v176_v35 = vshll.u32 %v1183_v34, %v167_v22 }
  0x3f   :  { %v179_v37 = vshll.u32 %v1184_v36, %v167_v22  ;;  %v182_v39 = vshll.u32 %v1185_v38, %v167_v22  ;;  %vm185_vm8 = vcmp.lt.s32.totalorder %v166_v21, 1  ;;  %vm186_vm9 = vcmp.lt.s32.totalorder %v166_v21, 2 }
  0x40   :  { %v169_v41 = vshrl.u32 %v1181_v30, %v168_v29  ;;  %v171_v42 = vshrl.u32 %v1182_v32, %v168_v29  ;;  %v174_v43 = vshrl.u32 %v1183_v34, %v168_v29  ;;  %v177_v44 = vshrl.u32 %v1184_v36, %v168_v29 }
  0x41   :  { %v180_v45 = vshrl.u32 %v1185_v38, %v168_v29  ;;  %v183_v47 = vshrl.u32 %v1186_v46, %v168_v29  ;;  %vm188_vm10 = vcmp.lt.s32.totalorder %v166_v21, 4  ;;  %v272_v51 = vsub.s32 32, %v271_v25 }
  0x42   :  { %v172_v48 = vor.u32 %v171_v42, %v170_v31  ;;  %v175_v49 = vor.u32 %v174_v43, %v173_v33  ;;  %v178_v50 = vor.u32 %v177_v44, %v176_v35  ;;  %vm187_vm11 = vcmp.lt.s32.totalorder %v166_v21, 3 }
  0x43   :  { %v181_v61 = vor.u32 %v180_v45, %v179_v37  ;;  %v184_v63 = vor.u32 %v183_v47, %v182_v39  ;;  %v274_v1 = vshll.u32 %v1181_v30, %v271_v25  ;;  %v277_v9 = vshll.u32 %v1182_v32, %v271_v25 }
  0x44   :  { %v189_v2 = vsel %vm185_vm8, %v169_v41, %v172_v48  ;;  %v190_v3 = vsel %vm188_vm10, %v178_v50, 2102212464  ;;  %v193_v4 = vsel %vm185_vm8, %v172_v48, %v175_v49  ;;  %v197_v5 = vsel %vm185_vm8, %v175_v49, %v178_v50 }
  0x45   :  { %v191_v6 = vsel %vm187_vm11, %v175_v49, %v190_v3  ;;  %v194_v7 = vsel %vm188_vm10, %v181_v61, 920167782  ;;  %v198_v8 = vsel %vm188_vm10, %v184_v63, 1326507024  ;;  %v273_v13 = vshrl.u32 %v1181_v30, %v272_v51 }
  0x46   :  { %v195_v10 = vsel %vm187_vm11, %v178_v50, %v194_v7  ;;  %v199_v12 = vsel %vm187_vm11, %v181_v61, %v198_v8  ;;  %v275_v14 = vshrl.u32 %v1182_v32, %v272_v51  ;;  %v192_v15 = vsel %vm186_vm9, %v189_v2, %v191_v6 }
  0x47   :  { %v196_v17 = vsel %vm186_vm9, %v193_v4, %v195_v10  ;;  %v200_v18 = vsel %vm186_vm9, %v197_v5, %v199_v12  ;;  %v278_v22 = vshrl.u32 %v1183_v34, %v272_v51  ;;  %v280_v39 = vshll.u32 %v1183_v34, %v271_v25 }
  0x48   :  { %v1318_v24 = vmul.u32.u64.low %v1282_v23, %v200_v18  ;;  %v1319_v29 = vmul.u32.u64.high %v1282_v23, %v200_v18, %v1318_v24  ;;  %v1322_v31 = vmul.u32.u64.low %v1282_v23, %v196_v17  ;;  %v1323_v33 = vmul.u32.u64.high %v1282_v23, %v196_v17, %v1322_v31 }
  0x49   :  { %v276_v35 = vor.u32 %v275_v14, %v274_v1  ;;  %v279_v37 = vor.u32 %v278_v22, %v277_v9  ;;  %v281_v41 = vshrl.u32 %v1184_v36, %v272_v51  ;;  %v283_v21 = vshll.u32 %v1184_v36, %v271_v25 }
  0x4a   :  { %v284_v42 = vshrl.u32 %v1185_v38, %v272_v51  ;;  %v286_v43 = vshll.u32 %v1185_v38, %v271_v25  ;;  %v287_v44 = vshrl.u32 %v1186_v46, %v272_v51  ;;  %v208_v45 = vmul.u32 %v1282_v23, %v192_v15 }
  0x4b   :  { %v282_v47 = vor.u32 %v281_v41, %v280_v39  ;;  %vm289_vm13 = vcmp.lt.s32.totalorder %v1297_v40, 1  ;;  %vm290_vm14 = vcmp.lt.s32.totalorder %v1297_v40, 2  ;;  %vm210_vm15 = vc.u32 %v1319_v29, %v1322_v31 }
  0x4c   :  { %v211_v48 = vadd.s32 1, %v1323_v33  ;;  %v285_v49 = vor.u32 %v284_v42, %v283_v21  ;;  %vm291_vm0 = vcmp.lt.s32.totalorder %v1297_v40, 3  ;;  %v288_v50 = vor.u32 %v287_v44, %v286_v43 }
  0x4d   :  { %vm292_vm1 = vcmp.lt.s32.totalorder %v1297_v40, 4  ;;  %v293_v25 = vsel %vm289_vm13, %v273_v13, %v276_v35  ;;  %v297_v51 = vsel %vm289_vm13, %v276_v35, %v279_v37  ;;  %v301_v1 = vsel %vm289_vm13, %v279_v37, %v282_v47 }
  0x4e   :  { %v212_v23 = vsel %vm210_vm15, %v211_v48, %v1323_v33  ;;  %v294_v61 = vsel %vm292_vm1, %v282_v47, 2102212464  ;;  %v298_v63 = vsel %vm292_vm1, %v285_v49, 920167782  ;;  %v302_v5 = vsel %vm292_vm1, %v288_v50, 1326507024 }
  0x4f   :  { %v213_v2 = vadd.s32 %v212_v23, %v208_v45  ;;  %v295_v3 = vsel %vm291_vm0, %v279_v37, %v294_v61  ;;  %v299_v4 = vsel %vm291_vm0, %v282_v47, %v298_v63  ;;  %v303_v8 = vsel %vm291_vm0, %v285_v49, %v302_v5 }
  0x50   :  { %v296_v6 = vsel %vm290_vm14, %v293_v25, %v295_v3  ;;  %v300_v7 = vsel %vm290_vm14, %v297_v51, %v299_v4  ;;  %v373_v9 = vsel %vm372_vm12, %v1290_v28, 0  ;;  %v304_v12 = vsel %vm290_vm14, %v301_v1, %v303_v8 }
  0x51   :  { %v214_v10 = vadd.s32 536870912, %v213_v2  ;;  %v1351_v13 = vmul.u32.u64.low %v1284_v26, %v300_v7  ;;  %v1352_v14 = vmul.u32.u64.high %v1284_v26, %v300_v7, %v1351_v13  ;;  %v369_v18 = vor.u32 8388608, %v1288_v27 }
  0x52   :  { %v1356_v15 = vmul.u32.u64.low %v1284_v26, %v304_v12  ;;  %v1357_v17 = vmul.u32.u64.high %v1284_v26, %v304_v12, %v1356_v15  ;;  %v465_v22 = vand.u32 2147483647, %v1280_v19  ;;  %v375_v33 = vand.u32 31, %v373_v9 }
  0x53   :  { %v215_v24 = vshrl.u32 %v214_v10, 30  ;;  %v312_v28 = vmul.u32 %v1284_v26, %v296_v6  ;;  %v315_v35 = vadd.s32 1, %v1352_v14  ;;  %v1366_v39 = vshll.u32 %v369_v18, 8 }
  0x54   :  { %v376_v37 = vsub.s32 32, %v375_v33  ;;  %vm314_vm3 = vc.u32 %v1357_v17, %v1351_v13  ;;  %v468_v41 = vand.u32 2139095040, %v1280_v19  ;;  %v1371_v27 = vand.u32 8388607, %v465_v22 }
  0x55   :  { %v216_v40 = vshll.u32 %v215_v24, 30  ;;  %v239_v42 = vsub.s32 4, %v215_v24  ;;  %v316_v43 = vsel %vm314_vm3, %v315_v35, %v1352_v14  ;;  %v374_v44 = vshrl.u32 %v373_v9, 5 }
  0x56   :  { %v317_v45 = vadd.s32 %v316_v43, %v312_v28  ;;  %v378_v47 = vshll.u32 %v1181_v30, %v375_v33  ;;  %v379_v48 = vshrl.u32 %v1182_v32, %v376_v37  ;;  %v381_v49 = vshll.u32 %v1182_v32, %v375_v33 }
  0x57   :  { %v1379_v21 = vsub.s32 %v213_v2, %v216_v40  ;;  %v382_v60 = vshrl.u32 %v1183_v34, %v376_v37  ;;  %v384_v25 = vshll.u32 %v1183_v34, %v375_v33  ;;  %v385_v51 = vshrl.u32 %v1184_v36, %v376_v37 }
  0x58   :  { %v209_v23 = vadd.s32 %v1322_v31, %v1319_v29  ;;  %v318_v61 = vadd.s32 536870912, %v317_v45  ;;  %v387_v63 = vshll.u32 %v1184_v36, %v375_v33  ;;  %v469_v1 = vshrl.u32 %v468_v41, 23 }
  0x59   :  { %v219_v50 = vsub.s32 0, %v1379_v21  ;;  %v240_v3 = vsel %vm155_vm2, %v239_v42, %v215_v24  ;;  %v388_v4 = vshrl.u32 %v1185_v38, %v376_v37  ;;  %vm396_vm6 = vcmp.lt.s32.totalorder %v374_v44, 4 }
  0x5a   :  { %v1396_v5 = vshrl.u32 %v318_v61, 30  ;;  %v377_v6 = vshrl.u32 %v1181_v30, %v376_v37  ;;  %v390_v7 = vshll.u32 %v1185_v38, %v375_v33  ;;  %v391_v29 = vshrl.u32 %v1186_v46, %v376_v37 }
  0x5b   :  { %v1021_v2 = vmin.u32 %v219_v50, %v1379_v21  ;;  %v380_v8 = vor.u32 %v379_v48, %v378_v47  ;;  %v383_v9 = vor.u32 %v382_v60, %v381_v49  ;;  %v386_v10 = vor.u32 %v385_v51, %v384_v25 }
  0x5c   :  { %v320_v12 = vshll.u32 %v1396_v5, 30  ;;  %v389_v14 = vor.u32 %v388_v4, %v387_v63  ;;  %vm393_vm7 = vcmp.lt.s32.totalorder %v374_v44, 1  ;;  %vm395_vm8 = vcmp.lt.s32.totalorder %v374_v44, 3 }
  0x5d   :  { %v221_v31 = vclz %v1021_v2  ;;  %v392_v18 = vor.u32 %v391_v29, %v390_v7  ;;  %v398_v24 = vsel %vm396_vm6, %v386_v10, 2102212464  ;;  %v1032_v28 = vadd.s32 4294967169, %v469_v1 }
  0x5e   :  { %v242_v40 = vsel %vm1375_vm4, 0, %v240_v3  ;;  %v1405_v33 = vsub.s32 %v317_v45, %v320_v12  ;;  %vm394_vm9 = vcmp.lt.s32.totalorder %v374_v44, 2  ;;  %v402_v35 = vsel %vm396_vm6, %v389_v14, 920167782 }
  0x5f   :  { %v1022_v15 = vadd.s32 4294967294, %v221_v31  ;;  %v397_v37 = vsel %vm393_vm7, %v377_v6, %v380_v8  ;;  %v401_v41 = vsel %vm393_vm7, %v380_v8, %v383_v9  ;;  %v403_v42 = vsel %vm395_vm8, %v386_v10, %v402_v35 }
  0x60   :  { %v323_v47 = vsub.s32 0, %v1405_v33  ;;  %v399_v48 = vsel %vm395_vm8, %v383_v9, %v398_v24  ;;  %v405_v49 = vsel %vm393_vm7, %v383_v9, %v386_v10  ;;  %v406_v25 = vsel %vm396_vm6, %v392_v18, 1326507024 }
  0x61   :  { %vm1023_vm10 = vcmp.lt.s32.totalorder %v1022_v15, 0  ;;  %vm259_vm11 = vcmp.lt.s32.totalorder %v1245_v53, 0  ;;  %v404_v61 = vsel %vm394_vm9, %v401_v41, %v403_v42  ;;  %v407_v63 = vsel %vm395_vm8, %v389_v14, %v406_v25 }
  0x62   :  { %v224_v43 = vsel %vm1023_vm10, 0, %v1022_v15  ;;  %v1025_v51 = vmin.u32 %v323_v47, %v1405_v33  ;;  %v408_v3 = vsel %vm394_vm9, %v405_v49, %v407_v63  ;;  %v475_v4 = vadd.s32 1, %v1032_v28 }
  0x63   :  { %v225_v50 = vsub.s32 32, %v224_v43  ;;  %v226_v45 = vshll.u32 %v1379_v21, %v224_v43  ;;  %v229_v60 = vsub.s32 4294967266, %v224_v43  ;;  %v246_v6 = vadd.s32 3, %v242_v40 }
  0x64   :  { %v325_v7 = vclz %v1025_v51  ;;  %v400_v21 = vsel %vm394_vm9, %v397_v37, %v399_v48  ;;  %v473_v29 = vor.u32 8388608, %v1371_v27  ;;  %vm476_vm12 = vcmp.gt.s32.totalorder %v475_v4, 0 }
  0x65   :  { %v227_v1 = vshrl.u32 %v209_v23, %v225_v50  ;;  %v230_v2 = vadd.s32 127, %v229_v60  ;;  %v1424_v9 = vmul.u32.u64.low %v1366_v39, %v408_v3  ;;  %v1425_v10 = vmul.u32.u64.high %v1366_v39, %v408_v3, %v1424_v9 }
  0x66   :  { %v1026_v12 = vadd.s32 4294967294, %v325_v7  ;;  %v1428_v14 = vmul.u32.u64.low %v1366_v39, %v404_v61  ;;  %v1429_v23 = vmul.u32.u64.high %v1366_v39, %v404_v61, %v1428_v14  ;;  %v343_v44 = vsub.s32 4, %v1396_v5 }
  0x67   :  { %v228_v31 = vor.u32 %v227_v1, %v226_v45  ;;  %v231_v8 = vshll.u32 %v230_v2, 23  ;;  %v477_v24 = vsel %vm476_vm12, %v475_v4, 0  ;;  %v1433_v28 = vand.u32 3, %v246_v6 }
  0x68   :  { %v313_v40 = vadd.s32 %v1351_v13, %v1357_v17  ;;  %vm1027_vm13 = vcmp.lt.s32.totalorder %v1026_v12, 0  ;;  %v479_v35 = vand.u32 31, %v477_v24  ;;  %v416_v42 = vmul.u32 %v1366_v39, %v400_v21 }
  0x69   :  { %v232_v15 = vor.u32 4788187, %v231_v8  ;;  %v235_v18 = vcvt.s32.f32 %v228_v31  ;;  %v328_v41 = vsel %vm1027_vm13, 0, %v1026_v12  ;;  %vm418_vm14 = vc.u32 %v1425_v10, %v1428_v14 }
  0x6a   :  { %vm1442_vm15 = vcmp.le.f32.partialorder %v257_v62, 0.7853982  ;;  %v329_v47 = vsub.s32 32, %v328_v41  ;;  %v330_v48 = vshll.u32 %v1405_v33, %v328_v41  ;;  %v333_v49 = vsub.s32 4294967266, %v328_v41 }
  0x6b   :  { %v233_v37 = vand.u32 2147483647, %v232_v15  ;;  %v419_v13 = vadd.s32 1, %v1429_v23  ;;  %v344_v39 = vsel %vm259_vm11, %v343_v44, %v1396_v5  ;;  %v1451_v50 = vshrl.u32 %v477_v24, 5 }
  0x6c   :  { %v480_v45 = vsub.s32 32, %v479_v35  ;;  %v331_v60 = vshrl.u32 %v313_v40, %v329_v47  ;;  %v334_v25 = vadd.s32 127, %v333_v49  ;;  %v482_v51 = vshll.u32 %v1181_v30, %v479_v35 }
  0x6d   :  { %v236_v17 = vmul.f32 %v235_v18, %v233_v37  ;;  %v420_v62 = vsel %vm418_vm14, %v419_v13, %v1429_v23  ;;  %v485_v1 = vshll.u32 %v1182_v32, %v479_v35  ;;  %v488_v5 = vshll.u32 %v1183_v34, %v479_v35 }
  0x6e   :  { %v421_v63 = vadd.s32 %v420_v62, %v416_v42  ;;  %v483_v33 = vshrl.u32 %v1182_v32, %v480_v45  ;;  %v332_v2 = vor.u32 %v331_v60, %v330_v48  ;;  %v335_v3 = vshll.u32 %v334_v25, 23 }
  0x6f   :  { %v237_v61 = vxor.u32 2147483648, %v236_v17  ;;  %v486_v4 = vshrl.u32 %v1183_v34, %v480_v45  ;;  %v489_v21 = vshrl.u32 %v1184_v36, %v480_v45  ;;  %v491_v31 = vshll.u32 %v1184_v36, %v479_v35 }
  0x70   :  { %v422_v7 = vadd.s32 536870912, %v421_v63  ;;  %v336_v9 = vor.u32 4788187, %v335_v3  ;;  %v339_v12 = vcvt.s32.f32 %v332_v2  ;;  %v484_v23 = vor.u32 %v483_v33, %v482_v51 }
  0x71   :  { %v238_v6 = vsel %vm155_vm2, %v237_v61, %v236_v17  ;;  %v487_v18 = vor.u32 %v486_v4, %v485_v1  ;;  %v492_v44 = vshrl.u32 %v1185_v38, %v480_v45  ;;  %v494_v40 = vshll.u32 %v1185_v38, %v479_v35 }
  0x72   :  { %v241_v8 = vsel %vm1375_vm4, %v1243_v52, %v238_v6  ;;  %v1466_v15 = vshrl.u32 %v422_v7, 30  ;;  %v337_v24 = vand.u32 2147483647, %v336_v9  ;;  %v495_v37 = vshrl.u32 %v1186_v46, %v480_v45 }
  0x73   :  { %1098 = vcosq.f32 %v241_v8  ;;  %v346_v41 = vsel %vm1442_vm15, 0, %v344_v39  ;;  %v493_v42 = vor.u32 %v492_v44, %v491_v31  ;;  %vm497_vm0 = vcmp.lt.s32.totalorder %v1451_v50, 1 }
  0x74   :  { %1100 = vsinq.f32 %v241_v8  ;;  %v424_v26 = vshll.u32 %v1466_v15, 30  ;;  %v340_v47 = vmul.f32 %v339_v12, %v337_v24  ;;  %v481_v48 = vshrl.u32 %v1181_v30, %v480_v45 }
  0x75   :  { %v490_v49 = vor.u32 %v489_v21, %v488_v5  ;;  %v1478_v13 = vshll.u32 %v473_v29, 8  ;;  %vm248_vm1 = vcmp.lt.s32.totalorder %v1433_v28, 2  ;;  %v496_v17 = vor.u32 %v495_v37, %v494_v40 }
  0x76   :  { %v1481_v35 = vsub.s32 %v421_v63, %v424_v26  ;;  %vm499_vm2 = vcmp.lt.s32.totalorder %v1451_v50, 3  ;;  %vm500_vm3 = vcmp.lt.s32.totalorder %v1451_v50, 4  ;;  %vm245_vm4 = vweird.f32 %v1243_v52 }
  0x77   :  { %v341_v39 = vxor.u32 2147483648, %v340_v47  ;;  %vm363_vm6 = vcmp.lt.s32.totalorder %v1253_v56, 0  ;;  %vm498_vm7 = vcmp.lt.s32.totalorder %v1451_v50, 2  ;;  %v502_v27 = vsel %vm500_vm3, %v490_v49, 2102212464 }
  0x78   :  { %v505_v29 = vsel %vm497_vm0, %v484_v23, %v487_v18  ;;  %vm249_vm8 = vcmp.eq.s32.totalorder %v1433_v28, 0  ;;  %v350_v45 = vadd.s32 3, %v346_v41  ;;  %v427_v60 = vsub.s32 0, %v1481_v35 }
  0x79   :  { %v506_v25 = vsel %vm500_vm3, %v493_v42, 920167782  ;;  %v342_v62 = vsel %vm259_vm11, %v341_v39, %v340_v47  ;;  %v501_v51 = vsel %vm497_vm0, %v481_v48, %v484_v23  ;;  %v503_v61 = vsel %vm499_vm2, %v487_v18, %v502_v27 }
  0x7a   :  { %v507_v63 = vsel %vm499_vm2, %v490_v49, %v506_v25  ;;  %v345_v33 = vsel %vm1442_vm15, %v1245_v53, %v342_v62  ;;  %vm1509_vm9 = vcmp.le.f32.partialorder %v361_v16, 0.7853982  ;;  %v1029_v2 = vmin.u32 %v427_v60, %v1481_v35 }
  0x7b   :  { %v508_v3 = vsel %vm498_vm7, %v505_v29, %v507_v63  ;;  %v509_v4 = vsel %vm497_vm0, %v487_v18, %v490_v49  ;;  %1102 = vcosq.f32 %v345_v33  ;;  %v510_v5 = vsel %vm500_vm3, %v496_v17, 1326507024 }
  0x7c   :  { %v1521_v43 = vmul.u32.u64.low %v1478_v13, %v508_v3  ;;  %v1522_v6 = vmul.u32.u64.high %v1478_v13, %v508_v3, %v1521_v43  ;;  %vm252_vm10 = vcmp.eq.s32.totalorder %v1433_v28, 2  ;;  %1104 = vsinq.f32 %v345_v33 }
  0x7d   :  { %v1099_v16 = vpop.eup %1098  ;;  %v429_v7 = vclz %v1029_v2  ;;  %v447_v21 = vsub.s32 4, %v1466_v15  ;;  %v351_v9 = vand.u32 3, %v350_v45  ;;  %v417_v12 = vadd.s32 %v1428_v14, %v1425_v10 }
  0x7e   :  { %v1101_v31 = vpop.eup %1100  ;;  %v253_v8 = vxor.u32 2147483648, %v1099_v16  ;;  %v511_v23 = vsel %vm499_vm2, %v493_v42, %v510_v5  ;;  %v504_v24 = vsel %vm498_vm7, %v501_v51, %v503_v61  ;;  %v569_v47 = vand.u32 2147483647, %v1255_v57 }
  0x7f   :  { %v250_v18 = vxor.u32 2147483648, %v1101_v31  ;;  %v1030_v44 = vadd.s32 4294967294, %v429_v7  ;;  %v512_v40 = vsel %vm498_vm7, %v509_v4, %v511_v23  ;;  %vm349_vm11 = vweird.f32 %v1245_v53 }
  0x80   :  { %v254_v37 = vsel %vm252_vm10, %v253_v8, %v1101_v31  ;;  %v1536_v41 = vmul.u32.u64.low %v1478_v13, %v512_v40  ;;  %v1537_v26 = vmul.u32.u64.high %v1478_v13, %v512_v40, %v1536_v41  ;;  %v448_v14 = vsel %vm363_vm6, %v447_v21, %v1466_v15 }
  0x81   :  { %v251_v10 = vsel %vm249_vm8, %v1099_v16, %v250_v18  ;;  %vm1031_vm12 = vcmp.lt.s32.totalorder %v1030_v44, 0  ;;  %v523_v50 = vadd.s32 1, %v1522_v6  ;;  %v520_v49 = vmul.u32 %v1478_v13, %v504_v24 }
  0x82   :  { %v255_v42 = vsel %vm248_vm1, %v251_v10, %v254_v37  ;;  %v432_v48 = vsel %vm1031_vm12, 0, %v1030_v44  ;;  %v572_v17 = vand.u32 2139095040, %v1255_v57  ;;  %v450_v15 = vsel %vm1509_vm9, 0, %v448_v14 }
  0x83   :  { %v256_v39 = vsel %vm245_vm4, nan, %v255_v42  ;;  %v433_v27 = vsub.s32 32, %v432_v48  ;;  %v434_v29 = vshll.u32 %v1481_v35, %v432_v48  ;;  %v437_v45 = vsub.s32 4294967266, %v432_v48 }
  0x84   :  { %985 = vst [vmem:[#allocation5] sm:$0xff] %v256_v39  ;;  %993 = vst [vmem:[#allocation5 + $0x40] sm:$0xff] %v256_v39  ;;  %vm522_vm13 = vc.u32 %v1537_v26, %v1521_v43  ;;  %v573_v28 = vshrl.u32 %v572_v17, 23  ;;  %v576_v13 = vand.u32 8388607, %v569_v47  ;;  %vm352_vm14 = vcmp.lt.s32.totalorder %v351_v9, 2 }
  0x85   :  { %v435_v60 = vshrl.u32 %v417_v12, %v433_v27  ;;  %v438_v52 = vadd.s32 127, %v437_v45  ;;  %v524_v25 = vsel %vm522_vm13, %v523_v50, %v1522_v6  ;;  %v1103_v62 = vpop.eup %1102  ;;  %vm353_vm15 = vcmp.eq.s32.totalorder %v351_v9, 0 }
  0x86   :  { %vm356_vm0 = vcmp.eq.s32.totalorder %v351_v9, 2  ;;  %v525_v35 = vadd.s32 %v524_v25, %v520_v49  ;;  %v1036_v51 = vadd.s32 4294967169, %v573_v28  ;;  %v1105_v61 = vpop.eup %1104  ;;  %v357_v63 = vxor.u32 2147483648, %v1103_v62 }
  0x87   :  { %v436_v33 = vor.u32 %v435_v60, %v434_v29  ;;  %v439_v2 = vshll.u32 %v438_v52, 23  ;;  %v454_v3 = vadd.s32 3, %v450_v15  ;;  %v354_v4 = vxor.u32 2147483648, %v1105_v61 }
  0x88   :  { %v526_v5 = vadd.s32 536870912, %v525_v35  ;;  %v577_v16 = vor.u32 8388608, %v576_v13  ;;  %v579_v7 = vadd.s32 1, %v1036_v51  ;;  %v358_v21 = vsel %vm356_vm0, %v357_v63, %v1105_v61 }
  0x89   :  { %v440_v31 = vor.u32 4788187, %v439_v2  ;;  %v443_v8 = vcvt.s32.f32 %v436_v33  ;;  %v676_v12 = vand.u32 2139095040, %v1257_v58  ;;  %v355_v6 = vsel %vm353_vm15, %v1103_v62, %v354_v4 }
  0x8a   :  { %v527_v23 = vshrl.u32 %v526_v5, 30  ;;  %vm580_vm1 = vcmp.gt.s32.totalorder %v579_v7, 0  ;;  %v673_v18 = vand.u32 2147483647, %v1257_v58  ;;  %v359_v44 = vsel %vm352_vm14, %v355_v6, %v358_v21 }
  0x8b   :  { %v441_v24 = vand.u32 2147483647, %v440_v31  ;;  %v581_v40 = vsel %vm580_vm1, %v579_v7, 0  ;;  %v360_v37 = vsel %vm349_vm11, nan, %v359_v44  ;;  %v677_v10 = vshrl.u32 %v676_v12, 23 }
  0x8c   :  { %v528_v41 = vshll.u32 %v527_v23, 30  ;;  %986 = vst [vmem:[#allocation5 + $0x8] sm:$0xff] %v360_v37  ;;  %994 = vst [vmem:[#allocation5 + $0x48] sm:$0xff] %v360_v37  ;;  %v1567_v50 = vand.u32 3, %v454_v3  ;;  %vm467_vm2 = vcmp.lt.s32.totalorder %v1280_v19, 0  ;;  %v583_v42 = vand.u32 31, %v581_v40 }
  0x8d   :  { %v444_v14 = vmul.f32 %v443_v8, %v441_v24  ;;  %v521_v48 = vadd.s32 %v1521_v43, %v1537_v26  ;;  %v1574_v49 = vshll.u32 %v577_v16, 8  ;;  %v1578_v53 = vand.u32 8388607, %v673_v18 }
  0x8e   :  { %v1572_v9 = vsub.s32 %v525_v35, %v528_v41  ;;  %v551_v39 = vsub.s32 4, %v527_v23  ;;  %v1580_v27 = vshrl.u32 %v581_v40, 5  ;;  %v584_v29 = vsub.s32 32, %v583_v42 }
  0x8f   :  { %v445_v17 = vxor.u32 2147483648, %v444_v14  ;;  %v586_v15 = vshll.u32 %v1181_v30, %v583_v42  ;;  %v589_v28 = vshll.u32 %v1182_v32, %v583_v42  ;;  %v1040_v43 = vadd.s32 4294967169, %v677_v10 }
  0x90   :  { %v531_v45 = vsub.s32 0, %v1572_v9  ;;  %v587_v13 = vshrl.u32 %v1182_v32, %v584_v29  ;;  %v590_v60 = vshrl.u32 %v1183_v34, %v584_v29  ;;  %v592_v52 = vshll.u32 %v1183_v34, %v583_v42 }
  0x91   :  { %v446_v26 = vsel %vm363_vm6, %v445_v17, %v444_v14  ;;  %v593_v35 = vshrl.u32 %v1184_v36, %v584_v29  ;;  %v681_v51 = vor.u32 8388608, %v1578_v53  ;;  %v1598_v61 = vsel %vm467_vm2, %v551_v39, %v527_v23 }
  0x92   :  { %v449_v25 = vsel %vm1509_vm9, %v1253_v56, %v446_v26  ;;  %v1033_v62 = vmin.u32 %v531_v45, %v1572_v9  ;;  %v585_v63 = vshrl.u32 %v1181_v30, %v584_v29  ;;  %v595_v33 = vshll.u32 %v1184_v36, %v583_v42 }
  0x93   :  { %1106 = vcosq.f32 %v449_v25  ;;  %vm1604_vm3 = vcmp.le.f32.partialorder %v465_v22, 0.7853982  ;;  %v588_v3 = vor.u32 %v587_v13, %v586_v15  ;;  %v591_v4 = vor.u32 %v590_v60, %v589_v28 }
  0x94   :  { %1108 = vsinq.f32 %v449_v25  ;;  %v533_v2 = vclz %v1033_v62  ;;  %vm460_vm4 = vcmp.eq.s32.totalorder %v1567_v50, 2  ;;  %v594_v5 = vor.u32 %v593_v35, %v592_v52 }
  0x95   :  { %v596_v16 = vshrl.u32 %v1185_v38, %v584_v29  ;;  %v598_v7 = vshll.u32 %v1185_v38, %v583_v42  ;;  %vm601_vm6 = vcmp.lt.s32.totalorder %v1580_v27, 1  ;;  %vm457_vm7 = vcmp.eq.s32.totalorder %v1567_v50, 0 }
  0x96   :  { %v1034_v21 = vadd.s32 4294967294, %v533_v2  ;;  %v599_v22 = vshrl.u32 %v1186_v46, %v584_v29  ;;  %vm602_vm8 = vcmp.lt.s32.totalorder %v1580_v27, 2  ;;  %vm604_vm9 = vcmp.lt.s32.totalorder %v1580_v27, 4 }
  0x97   :  { %vm456_vm10 = vcmp.lt.s32.totalorder %v1567_v50, 2  ;;  %v597_v31 = vor.u32 %v596_v16, %v595_v33  ;;  %vm603_vm11 = vcmp.lt.s32.totalorder %v1580_v27, 3  ;;  %v605_v8 = vsel %vm601_vm6, %v585_v63, %v588_v3 }
  0x98   :  { %v606_v12 = vsel %vm604_vm9, %v594_v5, 2102212464  ;;  %vm453_vm12 = vweird.f32 %v1253_v56  ;;  %vm1035_vm13 = vcmp.lt.s32.totalorder %v1034_v21, 0  ;;  %v600_v6 = vor.u32 %v599_v22, %v598_v7 }
  0x99   :  { %v607_v23 = vsel %vm603_vm11, %v591_v4, %v606_v12  ;;  %v609_v44 = vsel %vm601_vm6, %v588_v3, %v591_v4  ;;  %v536_v24 = vsel %vm1035_vm13, 0, %v1034_v21  ;;  %v610_v40 = vsel %vm604_vm9, %v597_v31, 920167782 }
  0x9a   :  { %v613_v37 = vsel %vm601_vm6, %v591_v4, %v594_v5  ;;  %v683_v41 = vadd.s32 1, %v1040_v43  ;;  %v537_v10 = vsub.s32 32, %v536_v24  ;;  %v538_v14 = vshll.u32 %v1572_v9, %v536_v24 }
  0x9b   :  { %v541_v42 = vsub.s32 4294967266, %v536_v24  ;;  %v611_v17 = vsel %vm603_vm11, %v594_v5, %v610_v40  ;;  %v608_v39 = vsel %vm602_vm8, %v605_v8, %v607_v23  ;;  %v614_v45 = vsel %vm604_vm9, %v600_v6, 1326507024 }
  0x9c   :  { %v612_v29 = vsel %vm602_vm8, %v609_v44, %v611_v17  ;;  %vm684_vm14 = vcmp.gt.s32.totalorder %v683_v41, 0  ;;  %v539_v15 = vshrl.u32 %v521_v48, %v537_v10  ;;  %v615_v43 = vsel %vm603_vm11, %v597_v31, %v614_v45 }
  0x9d   :  { %v542_v28 = vadd.s32 127, %v541_v42  ;;  %v685_v9 = vsel %vm684_vm14, %v683_v41, 0  ;;  %v1107_v26 = vpop.eup %1106  ;;  %v554_v13 = vsel %vm1604_vm3, 0, %v1598_v61  ;;  %v616_v60 = vsel %vm602_vm8, %v613_v37, %v615_v43 }
  0x9e   :  { %v1648_v52 = vmul.u32.u64.low %v1574_v49, %v612_v29  ;;  %v1649_v25 = vmul.u32.u64.high %v1574_v49, %v612_v29, %v1648_v52  ;;  %v1109_v62 = vpop.eup %1108  ;;  %v461_v48 = vxor.u32 2147483648, %v1107_v26  ;;  %v540_v35 = vor.u32 %v539_v15, %v538_v14 }
  0x9f   :  { %v543_v63 = vshll.u32 %v542_v28, 23  ;;  %v687_v33 = vand.u32 31, %v685_v9  ;;  %v458_v2 = vxor.u32 2147483648, %v1109_v62  ;;  %v624_v61 = vmul.u32 %v1574_v49, %v608_v39 }
  0xa0   :  { %v1653_v3 = vmul.u32.u64.low %v1574_v49, %v616_v60  ;;  %v1654_v4 = vmul.u32.u64.high %v1574_v49, %v616_v60, %v1653_v3  ;;  %v462_v27 = vsel %vm460_vm4, %v461_v48, %v1109_v62  ;;  %v547_v16 = vcvt.s32.f32 %v540_v35 }
  0xa1   :  { %v544_v5 = vor.u32 4788187, %v543_v63  ;;  %v688_v7 = vsub.s32 32, %v687_v33  ;;  %v459_v21 = vsel %vm457_vm7, %v1107_v26, %v458_v2  ;;  %v627_v22 = vadd.s32 1, %v1649_v25 }
  0xa2   :  { %v690_v31 = vshll.u32 %v1181_v30, %v687_v33  ;;  %v693_v8 = vshll.u32 %v1182_v32, %v687_v33  ;;  %v463_v12 = vsel %vm456_vm10, %v459_v21, %v462_v27  ;;  %v558_v49 = vadd.s32 3, %v554_v13 }
  0xa3   :  { %v545_v6 = vand.u32 2147483647, %v544_v5  ;;  %v691_v23 = vshrl.u32 %v1182_v32, %v688_v7  ;;  %v464_v44 = vsel %vm453_vm12, nan, %v463_v12  ;;  %vm626_vm15 = vc.u32 %v1654_v4, %v1648_v52 }
  0xa4   :  { %v686_v24 = vshrl.u32 %v685_v9, 5  ;;  %v694_v40 = vshrl.u32 %v1183_v34, %v688_v7  ;;  %987 = vst [vmem:[#allocation5 + $0x10] sm:$0xff] %v464_v44  ;;  %995 = vst [vmem:[#allocation5 + $0x50] sm:$0xff] %v464_v44  ;;  %v628_v41 = vsel %vm626_vm15, %v627_v22, %v1649_v25  ;;  %v696_v10 = vshll.u32 %v1183_v34, %v687_v33 }
  0xa5   :  { %v548_v37 = vmul.f32 %v547_v16, %v545_v6  ;;  %v692_v50 = vor.u32 %v691_v23, %v690_v31  ;;  %v629_v14 = vadd.s32 %v628_v41, %v624_v61  ;;  %v697_v17 = vshrl.u32 %v1184_v36, %v688_v7 }
  0xa6   :  { %v695_v42 = vor.u32 %v694_v40, %v693_v8  ;;  %v699_v56 = vshll.u32 %v1184_v36, %v687_v33  ;;  %v700_v29 = vshrl.u32 %v1185_v38, %v688_v7  ;;  %v702_v45 = vshll.u32 %v1185_v38, %v687_v33 }
  0xa7   :  { %v549_v39 = vxor.u32 2147483648, %v548_v37  ;;  %v703_v15 = vshrl.u32 %v1186_v46, %v688_v7  ;;  %v630_v28 = vadd.s32 536870912, %v629_v14  ;;  %v689_v43 = vshrl.u32 %v1181_v30, %v688_v7 }
  0xa8   :  { %v698_v9 = vor.u32 %v697_v17, %v696_v10  ;;  %vm705_vm0 = vcmp.lt.s32.totalorder %v686_v24, 1  ;;  %v701_v13 = vor.u32 %v700_v29, %v699_v56  ;;  %vm708_vm1 = vcmp.lt.s32.totalorder %v686_v24, 4 }
  0xa9   :  { %v550_v26 = vsel %vm467_vm2, %v549_v39, %v548_v37  ;;  %v704_v60 = vor.u32 %v703_v15, %v702_v45  ;;  %v631_v62 = vshrl.u32 %v630_v28, 30  ;;  %vm707_vm4 = vcmp.lt.s32.totalorder %v686_v24, 3 }
  0xaa   :  { %v553_v25 = vsel %vm1604_vm3, %v1280_v19, %v550_v26  ;;  %v710_v48 = vsel %vm708_vm1, %v698_v9, 2102212464  ;;  %vm706_vm6 = vcmp.lt.s32.totalorder %v686_v24, 2  ;;  %v713_v35 = vsel %vm705_vm0, %v692_v50, %v695_v42 }
  0xab   :  { %1110 = vcosq.f32 %v553_v25  ;;  %v714_v63 = vsel %vm708_vm1, %v701_v13, 920167782  ;;  %v632_v33 = vshll.u32 %v631_v62, 30  ;;  %v709_v2 = vsel %vm705_vm0, %v689_v43, %v692_v50 }
  0xac   :  { %1112 = vsinq.f32 %v553_v25  ;;  %v711_v3 = vsel %vm707_vm4, %v695_v42, %v710_v48  ;;  %v715_v61 = vsel %vm707_vm4, %v698_v9, %v714_v63  ;;  %v717_v27 = vsel %vm705_vm0, %v695_v42, %v698_v9 }
  0xad   :  { %v718_v1 = vsel %vm708_vm1, %v704_v60, 1326507024  ;;  %v721_v5 = vshll.u32 %v681_v51, 8  ;;  %v633_v16 = vsub.s32 %v629_v14, %v632_v33  ;;  %v716_v7 = vsel %vm706_vm6, %v713_v35, %v715_v61 }
  0xae   :  { %v719_v21 = vsel %vm707_vm4, %v701_v13, %v718_v1  ;;  %v559_v22 = vand.u32 3, %v558_v49  ;;  %v712_v23 = vsel %vm706_vm6, %v709_v2, %v711_v3  ;;  %v655_v37 = vsub.s32 4, %v631_v62 }
  0xaf   :  { %v720_v31 = vsel %vm706_vm6, %v717_v27, %v719_v21  ;;  %v1695_v8 = vmul.u32.u64.low %v721_v5, %v716_v7  ;;  %v1696_v12 = vmul.u32.u64.high %v721_v5, %v716_v7, %v1695_v8  ;;  %v635_v6 = vsub.s32 0, %v633_v16 }
  0xb0   :  { %v1699_v44 = vmul.u32.u64.low %v721_v5, %v720_v31  ;;  %v1700_v40 = vmul.u32.u64.high %v721_v5, %v720_v31, %v1699_v44  ;;  %vm557_vm2 = vweird.f32 %v1280_v19  ;;  %v780_v51 = vand.u32 2139095040, %v1259_v59 }
  0xb1   :  { %v1037_v53 = vmin.u32 %v635_v6, %v633_v16  ;;  %vm1706_vm3 = vcmp.le.f32.partialorder %v569_v47, 0.7853982  ;;  %v728_v41 = vmul.u32 %v721_v5, %v712_v23  ;;  %v731_v50 = vadd.s32 1, %v1696_v12 }
  0xb2   :  { %v777_v24 = vand.u32 2147483647, %v1259_v59  ;;  %vm560_vm7 = vcmp.lt.s32.totalorder %v559_v22, 2  ;;  %vm561_vm8 = vcmp.eq.s32.totalorder %v559_v22, 0  ;;  %vm571_vm9 = vcmp.lt.s32.totalorder %v1255_v57, 0 }
  0xb3   :  { %v637_v10 = vclz %v1037_v53  ;;  %vm564_vm10 = vcmp.eq.s32.totalorder %v559_v22, 2  ;;  %v656_v42 = vsel %vm571_vm9, %v655_v37, %v631_v62  ;;  %vm730_vm11 = vc.u32 %v1700_v40, %v1695_v8 }
  0xb4   :  { %v781_v47 = vshrl.u32 %v780_v51, 23  ;;  %v625_v39 = vadd.s32 %v1648_v52, %v1654_v4  ;;  %v732_v45 = vsel %vm730_vm11, %v731_v50, %v1696_v12  ;;  %v784_v9 = vand.u32 8388607, %v777_v24 }
  0xb5   :  { %v1111_v14 = vpop.eup %1110  ;;  %v1038_v29 = vadd.s32 4294967294, %v637_v10  ;;  %v733_v28 = vadd.s32 %v732_v45, %v728_v41  ;;  %v658_v13 = vsel %vm1706_vm3, 0, %v656_v42  ;;  %v94_v60 = vsel %vm1247_vm5, %v1212_v20, %v1251_v55 }
  0xb6   :  { %v1113_v17 = vpop.eup %1112  ;;  %v565_v56 = vxor.u32 2147483648, %v1111_v14  ;;  %v1044_v43 = vadd.s32 4294967169, %v781_v47  ;;  %v785_v61 = vor.u32 8388608, %v784_v9  ;;  %v123_v27 = vmul.f32 %v1265_v0, %v94_v60 }
  0xb7   :  { %v562_v15 = vxor.u32 2147483648, %v1113_v17  ;;  %vm1039_vm12 = vcmp.lt.s32.totalorder %v1038_v29, 0  ;;  %v734_v25 = vadd.s32 536870912, %v733_v28  ;;  %v1735_v21 = vadd.s32 3, %v658_v13 }
  0xb8   :  { %v566_v26 = vsel %vm564_vm10, %v565_v56, %v1113_v17  ;;  %v640_v4 = vsel %vm1039_vm12, 0, %v1038_v29  ;;  %v787_v62 = vadd.s32 1, %v1044_v43  ;;  %v729_v19 = vadd.s32 %v1695_v8, %v1700_v40 }
  0xb9   :  { %v563_v52 = vsel %vm561_vm8, %v1111_v14, %v562_v15  ;;  %v641_v35 = vsub.s32 32, %v640_v4  ;;  %v642_v63 = vshll.u32 %v633_v16, %v640_v4  ;;  %v645_v33 = vsub.s32 4294967266, %v640_v4 }
  0xba   :  { %v567_v48 = vsel %vm560_vm7, %v563_v52, %v566_v26  ;;  %v1731_v3 = vshrl.u32 %v734_v25, 30  ;;  %vm788_vm13 = vcmp.gt.s32.totalorder %v787_v62, 0  ;;  %v1740_v23 = vshll.u32 %v785_v61, 8 }
  0xbb   :  { %v568_v2 = vsel %vm557_vm2, nan, %v567_v48  ;;  %v643_v20 = vshrl.u32 %v625_v39, %v641_v35  ;;  %v646_v54 = vadd.s32 127, %v645_v33  ;;  %v789_v55 = vsel %vm788_vm13, %v787_v62, 0 }
  0xbc   :  { %988 = vst [vmem:[#allocation5 + $0x18] sm:$0xff] %v568_v2  ;;  %996 = vst [vmem:[#allocation5 + $0x58] sm:$0xff] %v568_v2  ;;  %v736_v1 = vshll.u32 %v1731_v3, 30  ;;  %v791_v5 = vand.u32 31, %v789_v55  ;;  %v1743_v44 = vadd.f32 %v1276_v11, %v123_v27  ;;  %vm675_vm5 = vcmp.lt.s32.totalorder %v1257_v58, 0 }
  0xbd   :  { %v644_v7 = vor.u32 %v643_v20, %v642_v63  ;;  %v647_v16 = vshll.u32 %v646_v54, 23  ;;  %v759_v10 = vsub.s32 4, %v1731_v3  ;;  %v790_v14 = vshrl.u32 %v789_v55, 5 }
  0xbe   :  { %v1738_v22 = vsub.s32 %v733_v28, %v736_v1  ;;  %v792_v31 = vsub.s32 32, %v791_v5  ;;  %v794_v37 = vshll.u32 %v1181_v30, %v791_v5  ;;  %v797_v51 = vshll.u32 %v1182_v32, %v791_v5 }
  0xbf   :  { %v648_v12 = vor.u32 4788187, %v647_v16  ;;  %v651_v6 = vcvt.s32.f32 %v644_v7  ;;  %v800_v40 = vshll.u32 %v1183_v34, %v791_v5  ;;  %v803_v42 = vshll.u32 %v1184_v36, %v791_v5 }
  0xc0   :  { %v739_v0 = vsub.s32 0, %v1738_v22  ;;  %v795_v53 = vshrl.u32 %v1182_v32, %v792_v31  ;;  %v798_v8 = vshrl.u32 %v1183_v34, %v792_v31  ;;  %v801_v50 = vshrl.u32 %v1184_v36, %v792_v31 }
  0xc1   :  { %v649_v41 = vand.u32 2147483647, %v648_v12  ;;  %v793_v17 = vshrl.u32 %v1181_v30, %v792_v31  ;;  %v804_v56 = vshrl.u32 %v1185_v38, %v792_v31  ;;  %v884_v39 = vand.u32 2139095040, %v1743_v44 }
  0xc2   :  { %v1041_v11 = vmin.u32 %v739_v0, %v1738_v22  ;;  %v796_v45 = vor.u32 %v795_v53, %v794_v37  ;;  %v799_v15 = vor.u32 %v798_v8, %v797_v51  ;;  %v802_v28 = vor.u32 %v801_v50, %v800_v40 }
  0xc3   :  { %v652_v47 = vmul.f32 %v651_v6, %v649_v41  ;;  %v805_v9 = vor.u32 %v804_v56, %v803_v42  ;;  %v806_v26 = vshll.u32 %v1185_v38, %v791_v5  ;;  %v807_v13 = vshrl.u32 %v1186_v46, %v792_v31 }
  0xc4   :  { %v741_v29 = vclz %v1041_v11  ;;  %vm809_vm14 = vcmp.lt.s32.totalorder %v790_v14, 1  ;;  %vm810_vm15 = vcmp.lt.s32.totalorder %v790_v14, 2  ;;  %vm811_vm0 = vcmp.lt.s32.totalorder %v790_v14, 3 }
  0xc5   :  { %v653_v43 = vxor.u32 2147483648, %v652_v47  ;;  %v808_v4 = vor.u32 %v807_v13, %v806_v26  ;;  %vm812_vm1 = vcmp.lt.s32.totalorder %v790_v14, 4  ;;  %v813_v25 = vsel %vm809_vm14, %v793_v17, %v796_v45 }
  0xc6   :  { %v1042_v60 = vadd.s32 4294967294, %v741_v29  ;;  %v814_v48 = vsel %vm812_vm1, %v802_v28, 2102212464  ;;  %v817_v35 = vsel %vm809_vm14, %v796_v45, %v799_v15  ;;  %v818_v2 = vsel %vm812_vm1, %v805_v9, 920167782 }
  0xc7   :  { %v654_v52 = vsel %vm571_vm9, %v653_v43, %v652_v47  ;;  %v815_v33 = vsel %vm811_vm0, %v799_v15, %v814_v48  ;;  %v760_v49 = vsel %vm675_vm5, %v759_v10, %v1731_v3  ;;  %v819_v55 = vsel %vm811_vm0, %v802_v28, %v818_v2 }
  0xc8   :  { %v657_v62 = vsel %vm1706_vm3, %v1255_v57, %v654_v52  ;;  %vm1043_vm4 = vcmp.lt.s32.totalorder %v1042_v60, 0  ;;  %v821_v27 = vsel %vm809_vm14, %v799_v15, %v802_v28  ;;  %v822_v1 = vsel %vm812_vm1, %v808_v4, 1326507024 }
  0xc9   :  { %1114 = vcosq.f32 %v657_v62  ;;  %v744_v63 = vsel %vm1043_vm4, 0, %v1042_v60  ;;  %v820_v16 = vsel %vm810_vm15, %v817_v35, %v819_v55  ;;  %v823_v31 = vsel %vm811_vm0, %v805_v9, %v822_v1 }
  0xca   :  { %1116 = vsinq.f32 %v657_v62  ;;  %v745_v61 = vsub.s32 32, %v744_v63  ;;  %v746_v20 = vshll.u32 %v1738_v22, %v744_v63  ;;  %v749_v54 = vsub.s32 4294967266, %v744_v63 }
  0xcb   :  { %v816_v12 = vsel %vm810_vm15, %v813_v25, %v815_v33  ;;  %v824_v22 = vsel %vm810_vm15, %v821_v27, %v823_v31  ;;  %v1783_v6 = vmul.u32.u64.low %v1740_v23, %v820_v16  ;;  %v1784_v0 = vmul.u32.u64.high %v1740_v23, %v820_v16, %v1783_v6 }
  0xcc   :  { %v747_v5 = vshrl.u32 %v729_v19, %v745_v61  ;;  %v750_v7 = vadd.s32 127, %v749_v54  ;;  %v1788_v53 = vmul.u32.u64.low %v1740_v23, %v824_v22  ;;  %v1789_v51 = vmul.u32.u64.high %v1740_v23, %v824_v22, %v1788_v53 }
  0xcd   :  { %v663_v19 = vand.u32 3, %v1735_v21  ;;  %v885_v41 = vshrl.u32 %v884_v39, 23  ;;  %vm1794_vm6 = vcmp.le.f32.partialorder %v673_v18, 0.7853982  ;;  %v832_v11 = vmul.u32 %v1740_v23, %v816_v12 }
  0xce   :  { %v748_v3 = vor.u32 %v747_v5, %v746_v20  ;;  %v751_v37 = vshll.u32 %v750_v7, 23  ;;  %v762_v10 = vsel %vm1794_vm6, 0, %v760_v49  ;;  %v835_v14 = vadd.s32 1, %v1784_v0 }
  0xcf   :  { %v1048_v42 = vadd.s32 4294967169, %v885_v41  ;;  %vm661_vm2 = vweird.f32 %v1255_v57  ;;  %vm834_vm3 = vc.u32 %v1789_v51, %v1783_v6  ;;  %vm665_vm7 = vcmp.eq.s32.totalorder %v663_v19, 0 }
  0xd0   :  { %v752_v40 = vor.u32 4788187, %v751_v37  ;;  %v755_v50 = vcvt.s32.f32 %v748_v3  ;;  %vm668_vm8 = vcmp.eq.s32.totalorder %v663_v19, 2  ;;  %v836_v47 = vsel %vm834_vm3, %v835_v14, %v1784_v0 }
  0xd1   :  { %v891_v17 = vadd.s32 1, %v1048_v42  ;;  %v766_v29 = vadd.s32 3, %v762_v10  ;;  %v837_v45 = vadd.s32 %v836_v47, %v832_v11  ;;  %vm664_vm9 = vcmp.lt.s32.totalorder %v663_v19, 2 }
  0xd2   :  { %v753_v21 = vand.u32 2147483647, %v752_v40  ;;  %v881_v28 = vand.u32 2147483647, %v1743_v44  ;;  %vm765_vm13 = vweird.f32 %v1257_v58  ;;  %vm778_vm3 = vcmp.le.f32.partialorder %v777_v24, 0.7853982 }
  0xd3   :  { %v1115_v18 = vpop.eup %1114  ;;  %vm892_vm10 = vcmp.gt.s32.totalorder %v891_v17, 0  ;;  %v838_v26 = vadd.s32 536870912, %v837_v45  ;;  %v1810_v62 = vand.u32 3, %v766_v29 }
  0xd4   :  { %v1117_v56 = vpop.eup %1116  ;;  %v669_v23 = vxor.u32 2147483648, %v1115_v18  ;;  %v756_v39 = vmul.f32 %v755_v50, %v753_v21  ;;  %v893_v13 = vsel %vm892_vm10, %v891_v17, 0  ;;  %v888_v33 = vand.u32 8388607, %v881_v28 }
  0xd5   :  { %v666_v15 = vxor.u32 2147483648, %v1117_v56  ;;  %v895_v52 = vand.u32 31, %v893_v13  ;;  %v1812_v48 = vshrl.u32 %v838_v26, 30  ;;  %v894_v57 = vshrl.u32 %v893_v13, 5 }
  0xd6   :  { %v670_v43 = vsel %vm668_vm8, %v669_v23, %v1117_v56  ;;  %v757_v9 = vxor.u32 2147483648, %v756_v39  ;;  %vm769_vm11 = vcmp.eq.s32.totalorder %v1810_v62, 0  ;;  %v889_v7 = vor.u32 8388608, %v888_v33 }
  0xd7   :  { %v667_v60 = vsel %vm665_vm7, %v1115_v18, %v666_v15  ;;  %v896_v2 = vsub.s32 32, %v895_v52  ;;  %v840_v61 = vshll.u32 %v1812_v48, 30  ;;  %v898_v20 = vshll.u32 %v1181_v30, %v895_v52 }
  0xd8   :  { %v671_v4 = vsel %vm664_vm9, %v667_v60, %v670_v43  ;;  %v758_v25 = vsel %vm675_vm5, %v757_v9, %v756_v39  ;;  %v901_v54 = vshll.u32 %v1182_v32, %v895_v52  ;;  %v904_v1 = vshll.u32 %v1183_v34, %v895_v52 }
  0xd9   :  { %v672_v35 = vsel %vm661_vm2, nan, %v671_v4  ;;  %v761_v63 = vsel %vm1794_vm6, %v1257_v58, %v758_v25  ;;  %v899_v49 = vshrl.u32 %v1182_v32, %v896_v2  ;;  %v902_v55 = vshrl.u32 %v1183_v34, %v896_v2 }
  0xda   :  { %989 = vst [vmem:[#allocation5 + $0x20] sm:$0xff] %v672_v35  ;;  %997 = vst [vmem:[#allocation5 + $0x60] sm:$0xff] %v672_v35  ;;  %1118 = vcosq.f32 %v761_v63  ;;  %v1826_v27 = vsub.s32 %v837_v45, %v840_v61  ;;  %v905_v5 = vshrl.u32 %v1184_v36, %v896_v2  ;;  %v897_v16 = vshrl.u32 %v1181_v30, %v896_v2 }
  0xdb   :  { %1120 = vsinq.f32 %v761_v63  ;;  %v907_v31 = vshll.u32 %v1184_v36, %v895_v52  ;;  %vm768_vm12 = vcmp.lt.s32.totalorder %v1810_v62, 2  ;;  %v900_v32 = vor.u32 %v899_v49, %v898_v20 }
  0xdc   :  { %v843_v12 = vsub.s32 0, %v1826_v27  ;;  %v903_v22 = vor.u32 %v902_v55, %v901_v54  ;;  %v908_v0 = vshrl.u32 %v1185_v38, %v896_v2  ;;  %v906_v34 = vor.u32 %v905_v5, %v904_v1 }
  0xdd   :  { %v910_v3 = vshll.u32 %v1185_v38, %v895_v52  ;;  %v911_v37 = vshrl.u32 %v1186_v46, %v896_v2  ;;  %vm913_vm5 = vcmp.lt.s32.totalorder %v894_v57, 1  ;;  %vm772_vm14 = vcmp.eq.s32.totalorder %v1810_v62, 2 }
  0xde   :  { %v833_v30 = vadd.s32 %v1783_v6, %v1789_v51  ;;  %v1045_v36 = vmin.u32 %v843_v12, %v1826_v27  ;;  %v909_v53 = vor.u32 %v908_v0, %v907_v31  ;;  %vm915_vm15 = vcmp.lt.s32.totalorder %v894_v57, 3 }
  0xdf   :  { %v912_v19 = vor.u32 %v911_v37, %v910_v3  ;;  %vm916_vm0 = vcmp.lt.s32.totalorder %v894_v57, 4  ;;  %v929_v41 = vshll.u32 %v889_v7, 8  ;;  %vm914_vm1 = vcmp.lt.s32.totalorder %v894_v57, 2 }
  0xe0   :  { %v845_v8 = vclz %v1045_v36  ;;  %v917_v40 = vsel %vm913_vm5, %v897_v16, %v900_v32  ;;  %v921_v50 = vsel %vm913_vm5, %v900_v32, %v903_v22  ;;  %v918_v38 = vsel %vm916_vm0, %v906_v34, 2102212464 }
  0xe1   :  { %v922_v11 = vsel %vm916_vm0, %v909_v53, 920167782  ;;  %v925_v46 = vsel %vm913_vm5, %v903_v22, %v906_v34  ;;  %v926_v10 = vsel %vm916_vm0, %v912_v19, 1326507024  ;;  %v919_v21 = vsel %vm915_vm15, %v903_v22, %v918_v38 }
  0xe2   :  { %v1046_v42 = vadd.s32 4294967294, %v845_v8  ;;  %v923_v18 = vsel %vm915_vm15, %v906_v34, %v922_v11  ;;  %v927_v6 = vsel %vm915_vm15, %v909_v53, %v926_v10  ;;  %v920_v17 = vsel %vm914_vm1, %v917_v40, %v919_v21 }
  0xe3   :  { %v924_v56 = vsel %vm914_vm1, %v921_v50, %v923_v18  ;;  %v928_v23 = vsel %vm914_vm1, %v925_v46, %v927_v6  ;;  %v936_v2 = vmul.u32 %v929_v41, %v920_v17  ;;  %v863_v58 = vsub.s32 4, %v1812_v48 }
  0xe4   :  { %v1119_v14 = vpop.eup %1118  ;;  %vm1047_vm4 = vcmp.lt.s32.totalorder %v1046_v42, 0  ;;  %v1846_v29 = vmul.u32.u64.low %v929_v41, %v928_v23  ;;  %v1847_v45 = vmul.u32.u64.high %v929_v41, %v928_v23, %v1846_v29  ;;  %vm779_vm2 = vcmp.lt.s32.totalorder %v1259_v59, 0 }
  0xe5   :  { %v1121_v51 = vpop.eup %1120  ;;  %v773_v47 = vxor.u32 2147483648, %v1119_v14  ;;  %v848_v43 = vsel %vm1047_vm4, 0, %v1046_v42  ;;  %v1851_v9 = vmul.u32.u64.low %v929_v41, %v924_v56  ;;  %v1852_v26 = vmul.u32.u64.high %v929_v41, %v924_v56, %v1851_v9 }
  0xe6   :  { %v770_v39 = vxor.u32 2147483648, %v1121_v51  ;;  %v849_v60 = vsub.s32 32, %v848_v43  ;;  %v850_v52 = vshll.u32 %v1826_v27, %v848_v43  ;;  %v853_v4 = vsub.s32 4294967266, %v848_v43 }
  0xe7   :  { %v774_v15 = vsel %vm772_vm14, %v773_v47, %v1121_v51  ;;  %vm938_vm6 = vc.u32 %v1847_v45, %v1851_v9  ;;  %v939_v61 = vadd.s32 1, %v1852_v26  ;;  %v864_v31 = vsel %vm779_vm2, %v863_v58, %v1812_v48 }
  0xe8   :  { %v771_v13 = vsel %vm769_vm11, %v1119_v14, %v770_v39  ;;  %v851_v63 = vshrl.u32 %v833_v30, %v849_v60  ;;  %v854_v33 = vadd.s32 127, %v853_v4  ;;  %v866_v34 = vsel %vm778_vm3, 0, %v864_v31 }
  0xe9   :  { %v775_v25 = vsel %vm768_vm12, %v771_v13, %v774_v15  ;;  %v940_v57 = vsel %vm938_vm6, %v939_v61, %v1852_v26  ;;  %v870_v37 = vadd.s32 3, %v866_v34  ;;  %v937_v41 = vadd.s32 %v1851_v9, %v1847_v45 }
  0xea   :  { %v776_v35 = vsel %vm765_vm13, nan, %v775_v25  ;;  %v852_v20 = vor.u32 %v851_v63, %v850_v52  ;;  %v855_v54 = vshll.u32 %v854_v33, 23  ;;  %v941_v62 = vadd.s32 %v940_v57, %v936_v2 }
  0xeb   :  { %990 = vst [vmem:[#allocation5 + $0x28] sm:$0xff] %v776_v35  ;;  %998 = vst [vmem:[#allocation5 + $0x68] sm:$0xff] %v776_v35  ;;  %v871_v53 = vand.u32 3, %v870_v37  ;;  %vm869_vm11 = vweird.f32 %v1259_v59  ;;  %vm883_vm12 = vcmp.lt.s32.totalorder %v1743_v44, 0  ;;  %vm882_vm13 = vcmp.le.f32.partialorder %v881_v28, 0.7853982 }
  0xec   :  { %v856_v49 = vor.u32 4788187, %v855_v54  ;;  %v859_v55 = vcvt.s32.f32 %v852_v20  ;;  %v942_v1 = vadd.s32 536870912, %v941_v62  ;;  %vm973_vm0 = vweird.f32 %v1743_v44 }
  0xed   :  { %vm876_vm8 = vcmp.eq.s32.totalorder %v871_v53, 2  ;;  %vm873_vm9 = vcmp.eq.s32.totalorder %v871_v53, 0  ;;  %vm872_vm10 = vcmp.lt.s32.totalorder %v871_v53, 2 }
  0xee   :  { %v857_v27 = vand.u32 2147483647, %v856_v49  ;;  %v943_v7 = vshrl.u32 %v942_v1, 30 }
  0xf0   :  { %v860_v5 = vmul.f32 %v859_v55, %v857_v27  ;;  %v944_v12 = vshll.u32 %v943_v7, 30  ;;  %v967_v39 = vsub.s32 4, %v943_v7 }
  0xf2   :  { %v861_v16 = vxor.u32 2147483648, %v860_v5  ;;  %v945_v22 = vsub.s32 %v941_v62, %v944_v12 }
  0xf4   :  { %v862_v32 = vsel %vm779_vm2, %v861_v16, %v860_v5  ;;  %v947_v3 = vsub.s32 0, %v945_v22 }
  0xf5   :  { %v865_v0 = vsel %vm778_vm3, %v1259_v59, %v862_v32  ;;  %v968_v59 = vsel %vm883_vm12, %v967_v39, %v943_v7 }
  0xf6   :  { %1122 = vcosq.f32 %v865_v0  ;;  %v1049_v30 = vmin.u32 %v947_v3, %v945_v22  ;;  %v970_v9 = vsel %vm882_vm13, 0, %v968_v59 }
  0xf7   :  { %1124 = vsinq.f32 %v865_v0  ;;  %v974_v26 = vadd.s32 3, %v970_v9 }
  0xf8   :  { %v949_v36 = vclz %v1049_v30 }
  0xf9   :  { %v975_v13 = vand.u32 3, %v974_v26 }
  0xfa   :  { %v1050_v19 = vadd.s32 4294967294, %v949_v36 }
  0xfb   :  { %vm980_vm5 = vcmp.eq.s32.totalorder %v975_v13, 2  ;;  %vm977_vm14 = vcmp.eq.s32.totalorder %v975_v13, 0  ;;  %vm976_vm15 = vcmp.lt.s32.totalorder %v975_v13, 2 }
  0xfc   :  { %vm1051_vm7 = vcmp.lt.s32.totalorder %v1050_v19, 0 }
  0xfd   :  { %v952_v24 = vsel %vm1051_vm7, 0, %v1050_v19 }
  0xfe   :  { %v953_v48 = vsub.s32 32, %v952_v24  ;;  %v954_v40 = vshll.u32 %v945_v22, %v952_v24  ;;  %v957_v50 = vsub.s32 4294967266, %v952_v24 }
 0x100   :  { %v1123_v8 = vpop.eup %1122  ;;  %v955_v10 = vshrl.u32 %v937_v41, %v953_v48  ;;  %v958_v14 = vadd.s32 127, %v957_v50 }
 0x101   :  { %v1125_v38 = vpop.eup %1124  ;;  %v877_v11 = vxor.u32 2147483648, %v1123_v8 }
 0x102   :  { %v874_v46 = vxor.u32 2147483648, %v1125_v38  ;;  %v956_v18 = vor.u32 %v955_v10, %v954_v40  ;;  %v959_v6 = vshll.u32 %v958_v14, 23 }
 0x103   :  { %v878_v42 = vsel %vm876_vm8, %v877_v11, %v1125_v38 }
 0x104   :  { %v875_v21 = vsel %vm873_vm9, %v1123_v8, %v874_v46  ;;  %v960_v17 = vor.u32 4788187, %v959_v6  ;;  %v963_v56 = vcvt.s32.f32 %v956_v18 }
 0x105   :  { %v879_v51 = vsel %vm872_vm10, %v875_v21, %v878_v42 }
 0x106   :  { %v880_v47 = vsel %vm869_vm11, nan, %v879_v51  ;;  %v961_v23 = vand.u32 2147483647, %v960_v17 }
 0x107   :  { %991 = vst [vmem:[#allocation5 + $0x30] sm:$0xff] %v880_v47  ;;  %999 = vst [vmem:[#allocation5 + $0x70] sm:$0xff] %v880_v47 }
 0x108   :  { %v964_v29 = vmul.f32 %v963_v56, %v961_v23 }
 0x10a   :  { %v965_v45 = vxor.u32 2147483648, %v964_v29 }
 0x10c   :  { %v966_v15 = vsel %vm883_vm12, %v965_v45, %v964_v29 }
 0x10d   :  { %v969_v43 = vsel %vm882_vm13, %v1743_v44, %v966_v15 }
 0x10e   :  { %1126 = vcosq.f32 %v969_v43 }
 0x10f   :  { %1128 = vsinq.f32 %v969_v43 }
 0x118   :  { %v1127_v60 = vpop.eup %1126 }
 0x119   :  { %v1129_v52 = vpop.eup %1128  ;;  %v981_v4 = vxor.u32 2147483648, %v1127_v60 }
 0x11a   :  { %v978_v25 = vxor.u32 2147483648, %v1129_v52 }
 0x11b   :  { %v982_v28 = vsel %vm980_vm5, %v981_v4, %v1129_v52 }
 0x11c   :  { %v979_v35 = vsel %vm977_vm14, %v1127_v60, %v978_v25 }
 0x11d   :  { %v983_v63 = vsel %vm976_vm15, %v979_v35, %v982_v28 }
 0x11e   :  { %v984_v33 = vsel %vm973_vm0, nan, %v983_v63 }
 0x11f   :  { %992 = vst [vmem:[#allocation5 + $0x38] sm:$0xff] %v984_v33  ;;  %1000 = vst [vmem:[#allocation5 + $0x78] sm:$0xff] %v984_v33 }
 0x120   :  { %1163 = shalt.err (!%p1160_p12)
}
 0x121   :  { %s1164_s22 = scalar_lea.hbm %s1890_s1, 2048 }
 0x122   :  { %p1165_p13 = scmp.ne.s32.totalorder %s1890_s1, %s1164_s22  ;;  %p1168_p0 = scmp.lt.u32.totalorder %s1164_s22, %s1890_s1 }
 0x124   :  { %p1170_p1 = pnand %p1168_p0, %p1165_p13 }
 0x126   :  { %1173 = shalt.err (!%p1170_p1)
}
 0x127   :  { %s1188_s27 = smov 512   ;;  %s1189_s28 = smov 32  }
 0x128   :  { %1012 = dma.vmem_to_hbm [thread:$0]  %s1007_s18, 2048, %s1890_s1, [#allocation4], %s1188_s27, %s1188_s27, %s1189_s28  }
 0x129   :  { %1176 = dma.done.wait [#allocation4], 2048  }
 0x12a   :  { %1177 = vsyncadd [#allocation4], 4294965248 }
 0x12b   :  { %1016 = vsyncpa [#allocation3], 1 }
 0x12c   :  { %1017 = vsyncpa [#allocation4], 1 }

</bundles_post_ra>
